<compile_context>
chip_gen: v7x
topology: tpu7x:2x2x1
jax: 0.10.0
libtpu: 0.0.40
codegen_flags: <defaults>
</compile_context>

<pallas_src>
import functools

import jax
import jax.numpy as jnp
from jax import lax
from jax.experimental import pallas as pl
from jax.experimental.pallas import tpu as pltpu

_LANES = 128
_SUB_ROWS = 512            # rows per inner sub-chunk (keeps live temps ~256 KiB each)
_MAX_TILE_ROWS = 8192      # DMA tile: 8192x128 f32 = 4 MiB/buffer, amortizes ~0.35 us/step
_VMEM_LIMIT = 40 * 1024 * 1024


def _round_up(a, b):
    return ((a + b - 1) // b) * b


def _pu_loss_kernel(inp_ref, tgt_ref, out_ref, *,
                    tile_n, sub, tiles_per_split, total_blocks, n_valid,
                    needs_mask, has_overrun, positive_label, unlabeled_label):
    s_id = pl.program_id(0)            # parallel split (megacore axis on 2-TC chips)
    j_id = pl.program_id(1)            # sequential reduction axis within a split

    @pl.when(j_id == 0)
    def _init():
        out_ref[...] = jnp.zeros_like(out_ref)

    # Unclamped global row-block index.  The BlockSpec index_map clamps the DMA
    # index to a real block, so overrun (s, j) steps re-see an already-resident
    # block; they are skipped (has_overrun) or fully masked below.
    block_idx = s_id * tiles_per_split + j_id

    def process(x_raw, t_raw, row_off):
        x = x_raw.astype(jnp.float32)
        t = t_raw
        pos_b = t == positive_label
        unl_b = t == unlabeled_label
        if needs_mask:
            # Kill pad elements and partial-block garbage via the global
            # element index (int32 math: fine for < 2**31 elements).
            row_i = lax.broadcasted_iota(jnp.int32, (sub, _LANES), 0)
            lane_i = lax.broadcasted_iota(jnp.int32, (sub, _LANES), 1)
            g_elem = (block_idx * tile_n + row_off + row_i) * _LANES + lane_i
            valid = g_elem < n_valid
            pos_b = jnp.logical_and(pos_b, valid)
            unl_b = jnp.logical_and(unl_b, valid)

        # One EUP transcendental per element: sigmoid(x) = 0.5*tanh(x/2) + 0.5.
        sig = 0.5 * jnp.tanh(0.5 * x) + 0.5
        pos_f = pos_b.astype(jnp.float32)          # counts
        unl_f = unl_b.astype(jnp.float32)
        y_pos_inv = jnp.where(pos_b, sig, 0.0)     # sigmoid(+x) on positives (NaN-safe)
        y_unl = jnp.where(unl_b, sig, 0.0)         # sigmoid(+x) on unlabeled

        def fold(v):
            # Pure vreg-wise adds (VPU); cross-lane reduction happens once,
            # outside the kernel, on the tiny partial-sum output.
            return v.reshape(sub // 8, 8, _LANES).sum(axis=0)

        out_ref[0, 0] += fold(pos_f)       # count of positives
        out_ref[0, 1] += fold(unl_f)       # count of unlabeled
        out_ref[0, 2] += fold(y_pos_inv)   # sum sigmoid(x) over positives
        out_ref[0, 3] += fold(y_unl)       # sum sigmoid(x) over unlabeled

    def do_block():
        n_sub = tile_n // sub
        if n_sub == 1:
            process(inp_ref[...], tgt_ref[...], 0)
        else:
            def body(k, carry):
                r0 = pl.multiple_of(k * sub, sub)
                process(inp_ref[pl.ds(r0, sub), :], tgt_ref[pl.ds(r0, sub), :], r0)
                return carry
            lax.fori_loop(0, n_sub, body, 0)

    if has_overrun:
        pl.when(block_idx < total_blocks)(do_block)
    else:
        do_block()


def pu_loss(inp, probs, target, *, prior, gamma=1.0, beta=0.0, nnpu=False,
            positive_label=0, unlabeled_label=1):
    """Pallas implementation of PULoss.forward.

    `probs` is accepted for signature parity with the PyTorch module but is
    not used by the forward computation (same as the reference).
    """
    del probs  # unused in the reference forward pass
    assert inp.shape == target.shape
    if not 0.0 < float(prior) < 1.0:
        raise NotImplementedError('The class prior should be in (0, 1)')

    x = inp.reshape(-1)          # layout-preserving flatten; no HBM pass
    t = target.reshape(-1)
    total = x.shape[0]
    assert total > 0

    # Only ragged inputs (size not a multiple of 8*128) pay a small pad pass;
    # pad values are killed in-kernel by the element-index mask.
    padded_total = _round_up(total, 8 * _LANES)
    if padded_total != total:
        x = jnp.pad(x, (0, padded_total - total))
        t = jnp.pad(t, (0, padded_total - total))
    rows = padded_total // _LANES            # multiple of 8

    if rows >= _SUB_ROWS:
        tile_n = min(_MAX_TILE_ROWS, (rows // _SUB_ROWS) * _SUB_ROWS)
        sub = _SUB_ROWS
    else:
        tile_n = rows
        sub = rows

    total_blocks = pl.cdiv(rows, tile_n)
    n_splits = 2 if total_blocks >= 2 else 1     # use both TCs on v7x; harmless elsewhere
    tiles_per_split = pl.cdiv(total_blocks, n_splits)
    has_overrun = n_splits * tiles_per_split != total_blocks
    needs_mask = total_blocks * tile_n * _LANES != total

    x2 = x.reshape(rows, _LANES)
    t2 = t.reshape(rows, _LANES)

    def row_block(s, j):
        # Clamp so overrun steps re-point at the split's previous block
        # (no extra DMA); their contribution is skipped/masked in-kernel.
        return (jnp.minimum(s * tiles_per_split + j, total_blocks - 1), 0)

    kernel = functools.partial(
        _pu_loss_kernel,
        tile_n=tile_n, sub=sub, tiles_per_split=tiles_per_split,
        total_blocks=total_blocks, n_valid=total,
        needs_mask=needs_mask, has_overrun=has_overrun,
        positive_label=positive_label, unlabeled_label=unlabeled_label)

    partials = pl.pallas_call(
        kernel,
        out_shape=jax.ShapeDtypeStruct((n_splits, 4, 8, _LANES), jnp.float32),
        grid_spec=pltpu.PrefetchScalarGridSpec(
            num_scalar_prefetch=0,
            grid=(n_splits, tiles_per_split),
            in_specs=[
                pl.BlockSpec((tile_n, _LANES), row_block),
                pl.BlockSpec((tile_n, _LANES), row_block),
            ],
            out_specs=pl.BlockSpec((1, 4, 8, _LANES), lambda s, j: (s, 0, 0, 0)),
        ),
        compiler_params=pltpu.CompilerParams(
            dimension_semantics=("parallel", "arbitrary"),
            vmem_limit_bytes=_VMEM_LIMIT),
    )(x2, t2)

    # Tiny epilogue in plain JAX (n_splits*4 KiB of data): combine partial sums.
    sums = jnp.sum(partials, axis=(0, 2, 3))
    cnt_pos, cnt_unl = sums[0], sums[1]
    sum_sig_pos, sum_sig_unl = sums[2], sums[3]
    n_pos = jnp.maximum(jnp.float32(1.0), cnt_pos)
    n_unl = jnp.maximum(jnp.float32(1.0), cnt_unl)
    prior_f = jnp.float32(prior)
    # sum(sigmoid(-x) over positives) == count(positives) - sum(sigmoid(x) over positives)
    positive_risk = prior_f * (cnt_pos - sum_sig_pos) / n_pos
    negative_risk = -prior_f * sum_sig_pos / n_pos + sum_sig_unl / n_unl
    if nnpu:
        return jnp.where(negative_risk < -jnp.float32(beta),
                         -jnp.float32(gamma) * negative_risk,
                         positive_risk + negative_risk)
    return positive_risk + negative_risk


def _pu_loss_ref(inp, target, *, prior, gamma=1.0, beta=0.0, nnpu=False):
    """Pure-JAX reference mirroring the PyTorch module."""
    x = inp.astype(jnp.float32)
    t = target.astype(jnp.float32)
    positive = (t == 0.0).astype(jnp.float32)
    unlabeled = (t == 1.0).astype(jnp.float32)
    n_pos = jnp.maximum(1.0, jnp.sum(positive))
    n_unl = jnp.maximum(1.0, jnp.sum(unlabeled))
    lf = lambda v: jax.nn.sigmoid(-v)
    y_pos = lf(positive * x) * positive
    y_pos_inv = lf(-(positive * x)) * positive
    y_unl = lf(-(unlabeled * x)) * unlabeled
    pos_risk = prior * jnp.sum(y_pos) / n_pos
    neg_risk = -prior * jnp.sum(y_pos_inv) / n_pos + jnp.sum(y_unl) / n_unl
    return jnp.where(jnp.logical_and(neg_risk < -beta, nnpu),
                     -gamma * neg_risk, pos_risk + neg_risk)


if __name__ == "__main__":
    key = jax.random.PRNGKey(0)
    k1, k2, k3, k4, k5 = jax.random.split(key, 5)

    prior = 0.3

    # Case 1: small lane-aligned input (8, 128) — single tile, no masking.
    inp = jax.random.normal(k1, (8, 128), dtype=jnp.float32)
    target = jax.random.bernoulli(k2, p=0.7, shape=(8, 128)).astype(jnp.float32)
    probs = jax.nn.sigmoid(jax.random.normal(k3, (8, 128), dtype=jnp.float32))

    out = jax.block_until_ready(pu_loss(inp, probs, target, prior=prior))
    ref = _pu_loss_ref(inp, target, prior=prior)
    assert jnp.allclose(out, ref, atol=1e-5, rtol=1e-5), (out, ref)

    out_nn = jax.block_until_ready(
        pu_loss(inp, probs, target, prior=prior, nnpu=True))
    ref_nn = _pu_loss_ref(inp, target, prior=prior, nnpu=True)
    assert jnp.allclose(out_nn, ref_nn, atol=1e-5, rtol=1e-5), (out_nn, ref_nn)

    # Case 2: non-1024-aligned rows — exercises the small pad, the in-kernel
    # element mask, the 2-way parallel split and the inner sub-chunk loop.
    inp2 = jax.random.normal(k4, (1100, 128), dtype=jnp.float32)
    target2 = jax.random.bernoulli(k5, p=0.6, shape=(1100, 128)).astype(jnp.float32)
    probs2 = jax.nn.sigmoid(inp2)

    out2 = jax.block_until_ready(pu_loss(inp2, probs2, target2, prior=prior))
    ref2 = _pu_loss_ref(inp2, target2, prior=prior)
    assert jnp.allclose(out2, ref2, atol=1e-5, rtol=1e-4), (out2, ref2)

    out2_nn = jax.block_until_ready(
        pu_loss(inp2, probs2, target2, prior=prior, nnpu=True))
    ref2_nn = _pu_loss_ref(inp2, target2, prior=prior, nnpu=True)
    assert jnp.allclose(out2_nn, ref2_nn, atol=1e-5, rtol=1e-4), (out2_nn, ref2_nn)

    print("KERNEL_OK")
</pallas_src>

<mosaic_0001>
module attributes {stable_mosaic.version = 11 : i64} {
  func.func @_pu_loss_kernel(%arg0: i32, %arg1: i32, %arg2: memref<8x128xf32, #tpu.memory_space<vmem>>, %arg3: memref<8x128xf32, #tpu.memory_space<vmem>>, %arg4: memref<1x4x8x128xf32, #tpu.memory_space<vmem>>) attributes {dimension_semantics = [#tpu.dimension_semantics<parallel>, #tpu.dimension_semantics<arbitrary>], iteration_bounds = array<i64: 1, 1>, scalar_prefetch = 0 : i64, scratch_operands = 0 : i64, tpu.core_type = #tpu.core_type<tc>, window_params = [{transform_indices = @transform_0, window_bounds = array<i64: 8, 128>}, {transform_indices = @transform_1, window_bounds = array<i64: 8, 128>}, {transform_indices = @transform_2, window_bounds = array<i64: 1, 4, 8, 128>}]} {
    %c0_i32 = arith.constant 0 : i32
    %0 = arith.cmpi eq, %arg1, %c0_i32 : i32
    %1 = arith.extui %0 : i1 to i32
    %c0_i32_0 = arith.constant 0 : i32
    %2 = arith.cmpi ne, %1, %c0_i32_0 : i32
    scf.if %2 {
      %cst_43 = arith.constant 0.000000e+00 : f32
      %56 = vector.broadcast %cst_43 : f32 to vector<1x4x8x128xf32>
      %c0_44 = arith.constant 0 : index
      %c0_45 = arith.constant 0 : index
      %c0_46 = arith.constant 0 : index
      %c0_47 = arith.constant 0 : index
      %57 = vector.load %arg4[%c0_44, %c0_45, %c0_46, %c0_47] : memref<1x4x8x128xf32, #tpu.memory_space<vmem>>, vector<1x4x8x128xf32>
      tpu.vector_store %arg4[%c0_44, %c0_45, %c0_46, %c0_47], %56 {strides = array<i32>} : memref<1x4x8x128xf32, #tpu.memory_space<vmem>>, vector<1x4x8x128xf32>,
    } else {
    }
    %c0 = arith.constant 0 : index
    %c0_1 = arith.constant 0 : index
    %3 = vector.load %arg2[%c0, %c0_1] : memref<8x128xf32, #tpu.memory_space<vmem>>, vector<8x128xf32>
    %c0_2 = arith.constant 0 : index
    %c0_3 = arith.constant 0 : index
    %4 = vector.load %arg3[%c0_2, %c0_3] : memref<8x128xf32, #tpu.memory_space<vmem>>, vector<8x128xf32>
    %cst = arith.constant 0.000000e+00 : f32
    %5 = vector.broadcast %cst : f32 to vector<8x128xf32>
    %6 = arith.cmpf oeq, %4, %5 : vector<8x128xf32>
    %cst_4 = arith.constant 1.000000e+00 : f32
    %7 = vector.broadcast %cst_4 : f32 to vector<8x128xf32>
    %8 = arith.cmpf oeq, %4, %7 : vector<8x128xf32>
    %cst_5 = arith.constant 5.000000e-01 : f32
    %9 = vector.broadcast %cst_5 : f32 to vector<8x128xf32>
    %10 = arith.mulf %9, %3 : vector<8x128xf32>
    %11 = math.tanh %10 : vector<8x128xf32>
    %cst_6 = arith.constant 5.000000e-01 : f32
    %12 = vector.broadcast %cst_6 : f32 to vector<8x128xf32>
    %13 = arith.mulf %12, %11 : vector<8x128xf32>
    %cst_7 = arith.constant 5.000000e-01 : f32
    %14 = vector.broadcast %cst_7 : f32 to vector<8x128xf32>
    %15 = arith.addf %13, %14 : vector<8x128xf32>
    %16 = arith.extui %6 : vector<8x128xi1> to vector<8x128xi32>
    %17 = arith.sitofp %16 : vector<8x128xi32> to vector<8x128xf32>
    %18 = arith.extui %8 : vector<8x128xi1> to vector<8x128xi32>
    %19 = arith.sitofp %18 : vector<8x128xi32> to vector<8x128xf32>
    %cst_8 = arith.constant 0.000000e+00 : f32
    %20 = vector.broadcast %cst_8 : f32 to vector<8x128xf32>
    %21 = arith.select %6, %15, %20 : vector<8x128xi1>, vector<8x128xf32>
    %cst_9 = arith.constant 0.000000e+00 : f32
    %22 = vector.broadcast %cst_9 : f32 to vector<8x128xf32>
    %23 = arith.select %8, %15, %22 : vector<8x128xi1>, vector<8x128xf32>
    %c0_10 = arith.constant 0 : index
    %c0_11 = arith.constant 0 : index
    %c0_12 = arith.constant 0 : index
    %c0_13 = arith.constant 0 : index
    %24 = vector.load %arg4[%c0_10, %c0_11, %c0_12, %c0_13] : memref<1x4x8x128xf32, #tpu.memory_space<vmem>>, vector<1x1x8x128xf32>
    %25 = vector.shape_cast %24 : vector<1x1x8x128xf32> to vector<8x128xf32>
    %26 = vector.shape_cast %17 : vector<8x128xf32> to vector<1x8x128xf32>
    %cst_14 = arith.constant dense<0.000000e+00> : vector<8x128xf32>
    %27 = vector.multi_reduction <add>, %26, %cst_14 [0] : vector<1x8x128xf32> to vector<8x128xf32>
    %28 = arith.addf %25, %27 : vector<8x128xf32>
    %c0_15 = arith.constant 0 : index
    %c0_16 = arith.constant 0 : index
    %c0_17 = arith.constant 0 : index
    %c0_18 = arith.constant 0 : index
    %29 = vector.load %arg4[%c0_15, %c0_16, %c0_17, %c0_18] : memref<1x4x8x128xf32, #tpu.memory_space<vmem>>, vector<1x1x8x128xf32>
    %30 = vector.shape_cast %29 : vector<1x1x8x128xf32> to vector<8x128xf32>
    %31 = vector.shape_cast %28 : vector<8x128xf32> to vector<1x1x8x128xf32>
    tpu.vector_store %arg4[%c0_15, %c0_16, %c0_17, %c0_18], %31 {strides = array<i32>} : memref<1x4x8x128xf32, #tpu.memory_space<vmem>>, vector<1x1x8x128xf32>,
    %c0_19 = arith.constant 0 : index
    %c1 = arith.constant 1 : index
    %c0_20 = arith.constant 0 : index
    %c0_21 = arith.constant 0 : index
    %32 = vector.load %arg4[%c0_19, %c1, %c0_20, %c0_21] : memref<1x4x8x128xf32, #tpu.memory_space<vmem>>, vector<1x1x8x128xf32>
    %33 = vector.shape_cast %32 : vector<1x1x8x128xf32> to vector<8x128xf32>
    %34 = vector.shape_cast %19 : vector<8x128xf32> to vector<1x8x128xf32>
    %cst_22 = arith.constant dense<0.000000e+00> : vector<8x128xf32>
    %35 = vector.multi_reduction <add>, %34, %cst_22 [0] : vector<1x8x128xf32> to vector<8x128xf32>
    %36 = arith.addf %33, %35 : vector<8x128xf32>
    %c0_23 = arith.constant 0 : index
    %c1_24 = arith.constant 1 : index
    %c0_25 = arith.constant 0 : index
    %c0_26 = arith.constant 0 : index
    %37 = vector.load %arg4[%c0_23, %c1_24, %c0_25, %c0_26] : memref<1x4x8x128xf32, #tpu.memory_space<vmem>>, vector<1x1x8x128xf32>
    %38 = vector.shape_cast %37 : vector<1x1x8x128xf32> to vector<8x128xf32>
    %39 = vector.shape_cast %36 : vector<8x128xf32> to vector<1x1x8x128xf32>
    tpu.vector_store %arg4[%c0_23, %c1_24, %c0_25, %c0_26], %39 {strides = array<i32>} : memref<1x4x8x128xf32, #tpu.memory_space<vmem>>, vector<1x1x8x128xf32>,
    %c0_27 = arith.constant 0 : index
    %c2 = arith.constant 2 : index
    %c0_28 = arith.constant 0 : index
    %c0_29 = arith.constant 0 : index
    %40 = vector.load %arg4[%c0_27, %c2, %c0_28, %c0_29] : memref<1x4x8x128xf32, #tpu.memory_space<vmem>>, vector<1x1x8x128xf32>
    %41 = vector.shape_cast %40 : vector<1x1x8x128xf32> to vector<8x128xf32>
    %42 = vector.shape_cast %21 : vector<8x128xf32> to vector<1x8x128xf32>
    %cst_30 = arith.constant dense<0.000000e+00> : vector<8x128xf32>
    %43 = vector.multi_reduction <add>, %42, %cst_30 [0] : vector<1x8x128xf32> to vector<8x128xf32>
    %44 = arith.addf %41, %43 : vector<8x128xf32>
    %c0_31 = arith.constant 0 : index
    %c2_32 = arith.constant 2 : index
    %c0_33 = arith.constant 0 : index
    %c0_34 = arith.constant 0 : index
    %45 = vector.load %arg4[%c0_31, %c2_32, %c0_33, %c0_34] : memref<1x4x8x128xf32, #tpu.memory_space<vmem>>, vector<1x1x8x128xf32>
    %46 = vector.shape_cast %45 : vector<1x1x8x128xf32> to vector<8x128xf32>
    %47 = vector.shape_cast %44 : vector<8x128xf32> to vector<1x1x8x128xf32>
    tpu.vector_store %arg4[%c0_31, %c2_32, %c0_33, %c0_34], %47 {strides = array<i32>} : memref<1x4x8x128xf32, #tpu.memory_space<vmem>>, vector<1x1x8x128xf32>,
    %c0_35 = arith.constant 0 : index
    %c3 = arith.constant 3 : index
    %c0_36 = arith.constant 0 : index
    %c0_37 = arith.constant 0 : index
    %48 = vector.load %arg4[%c0_35, %c3, %c0_36, %c0_37] : memref<1x4x8x128xf32, #tpu.memory_space<vmem>>, vector<1x1x8x128xf32>
    %49 = vector.shape_cast %48 : vector<1x1x8x128xf32> to vector<8x128xf32>
    %50 = vector.shape_cast %23 : vector<8x128xf32> to vector<1x8x128xf32>
    %cst_38 = arith.constant dense<0.000000e+00> : vector<8x128xf32>
    %51 = vector.multi_reduction <add>, %50, %cst_38 [0] : vector<1x8x128xf32> to vector<8x128xf32>
    %52 = arith.addf %49, %51 : vector<8x128xf32>
    %c0_39 = arith.constant 0 : index
    %c3_40 = arith.constant 3 : index
    %c0_41 = arith.constant 0 : index
    %c0_42 = arith.constant 0 : index
    %53 = vector.load %arg4[%c0_39, %c3_40, %c0_41, %c0_42] : memref<1x4x8x128xf32, #tpu.memory_space<vmem>>, vector<1x1x8x128xf32>
    %54 = vector.shape_cast %53 : vector<1x1x8x128xf32> to vector<8x128xf32>
    %55 = vector.shape_cast %52 : vector<8x128xf32> to vector<1x1x8x128xf32>
    tpu.vector_store %arg4[%c0_39, %c3_40, %c0_41, %c0_42], %55 {strides = array<i32>} : memref<1x4x8x128xf32, #tpu.memory_space<vmem>>, vector<1x1x8x128xf32>,
    return
  }
  func.func @transform_0(%arg0: i32, %arg1: i32) -> (i32, i32) {
    %c1_i32 = arith.constant 1 : i32
    %0 = arith.muli %arg0, %c1_i32 : i32
    %1 = arith.addi %0, %arg1 : i32
    %c0_i32 = arith.constant 0 : i32
    %2 = arith.minsi %1, %c0_i32 : i32
    %c0_i32_0 = arith.constant 0 : i32
    %c0_i32_1 = arith.constant 0 : i32
    return %2, %c0_i32_0 : i32, i32
  }
  func.func @transform_1(%arg0: i32, %arg1: i32) -> (i32, i32) {
    %c1_i32 = arith.constant 1 : i32
    %0 = arith.muli %arg0, %c1_i32 : i32
    %1 = arith.addi %0, %arg1 : i32
    %c0_i32 = arith.constant 0 : i32
    %2 = arith.minsi %1, %c0_i32 : i32
    %c0_i32_0 = arith.constant 0 : i32
    %c0_i32_1 = arith.constant 0 : i32
    return %2, %c0_i32_0 : i32, i32
  }
  func.func @transform_2(%arg0: i32, %arg1: i32) -> (i32, i32, i32, i32) {
    %c0_i32 = arith.constant 0 : i32
    %c0_i32_0 = arith.constant 0 : i32
    %c0_i32_1 = arith.constant 0 : i32
    %c0_i32_2 = arith.constant 0 : i32
    return %arg0, %c0_i32, %c0_i32_0, %c0_i32_1 : i32, i32, i32, i32
  }
}

</mosaic_0001>

<bundles_post_ra>
// kernel: tpu_custom_call.1
= control target key start
LH: loop header
LB: loop body
LE: loop exit
PB: predicated region body
PF: predicated region fallthrough
CT: control target
= control target key end

     0   :  { %7 = vsyncpa [#allocation3], 0  ;;  %s254_s0 = inlined_call_operand.hbm [shape: f32[8,128], index: 0, kind: input, shape index: {}]   ;;  %s255_s1 = inlined_call_operand.hbm [shape: f32[8,128], index: 1, kind: input, shape index: {}]   ;;  %s256_s2 = inlined_call_operand.hbm [shape: f32[1,4,8,128], index: 2, kind: output, shape index: {}]  }
   0x1   :  { %8 = vsyncpa [#allocation6], 0 }
   0x2   :  { %9 = vsyncpa [#allocation4], 0  ;;  %s197_s9 = smov [#allocation2]   ;;  %s198_s11 = smov [#allocation5]  }
   0x3   :  { %s21_s10 = sshll.u32 %s197_s9, 4  ;;  %s36_s12 = sshll.u32 %s198_s11, 4  ;;  %s22_s10 = int_to_ptr.vmem [resolvable:$true] %s21_s10  ;;  %s37_s12 = int_to_ptr.vmem [resolvable:$true] %s36_s12 }
   0x4   :  { %s125_s15 = scalar_lea.hbm %s254_s0, 128 }
   0x5   :  { %p126_p0 = scmp.ne.s32.totalorder %s254_s0, %s125_s15  ;;  %p129_p1 = scmp.lt.u32.totalorder %s125_s15, %s254_s0 }
   0x7   :  { %p131_p2 = pnand %p129_p1, %p126_p0 }
   0x9   :  { %134 = shalt.err (!%p131_p2)
}
   0xa   :  { %s135_s20 = scalar_lea.vmem %s22_s10, 128  ;;  %p140_p4 = scmp.lt.s32.totalorder %s22_s10, %s22_s10 }
   0xb   :  { %p136_p3 = scmp.ne.s32.totalorder %s22_s10, %s135_s20  ;;  %p141_p5 = scmp.lt.s32.totalorder %s135_s20, %s135_s20 }
   0xd   :  { %p142_p6 = por %p141_p5, %p140_p4 }
   0xf   :  { %p143_p7 = pnand %p142_p6, %p136_p3 }
  0x11   :  { %146 = shalt.err (!%p143_p7)
}
  0x12   :  { %24 = dma.hbm_to_vmem [thread:$0]  %s254_s0, 128, %s22_s10, [#allocation3]  }
  0x13   :  { %s147_s25 = scalar_lea.hbm %s255_s1, 128 }
  0x14   :  { %p148_p8 = scmp.ne.s32.totalorder %s255_s1, %s147_s25  ;;  %p151_p9 = scmp.lt.u32.totalorder %s147_s25, %s255_s1 }
  0x16   :  { %p153_p10 = pnand %p151_p9, %p148_p8 }
  0x18   :  { %156 = shalt.err (!%p153_p10)
}
  0x19   :  { %s157_s30 = scalar_lea.vmem %s37_s12, 128  ;;  %p162_p12 = scmp.lt.s32.totalorder %s37_s12, %s37_s12 }
  0x1a   :  { %p158_p11 = scmp.ne.s32.totalorder %s37_s12, %s157_s30  ;;  %p163_p13 = scmp.lt.s32.totalorder %s157_s30, %s157_s30 }
  0x1c   :  { %p164_p0 = por %p163_p13, %p162_p12 }
  0x1e   :  { %p165_p1 = pnand %p164_p0, %p158_p11 }
  0x20   :  { %168 = shalt.err (!%p165_p1)
}
  0x21   :  { %39 = dma.hbm_to_vmem [thread:$0]  %s255_s1, 128, %s37_s12, [#allocation6]  }
  0x22   :  { %191 = dma.done.wait [#allocation3], 128  }
  0x23   :  { %192 = vsyncadd [#allocation3], 4294967168 }
  0x24   :  { %193 = dma.done.wait [#allocation6], 128  }
  0x25   :  { %194 = vsyncadd [#allocation6], 4294967168  ;;  %v61_v0 = vld [vmem:[#allocation5] sm:$0xff]  ;;  %v60_v1 = vld [vmem:[#allocation2] sm:$0xff]  ;;  %v199_v3 = vmov 0.0   ;;  %s200_s4 = smov [#allocation7]  }
  0x26   :  { %vm62_vm0 = vcmp.eq.f32.partialorder %v61_v0, 0.0  ;;  %vm63_vm1 = vcmp.eq.f32.partialorder %v61_v0, 1.0  ;;  %v64_v2 = vmul.f32 0.5, %v60_v1  ;;  %s98_s1 = sshll.u32 %s200_s4, 4  ;;  %s99_s1 = int_to_ptr.vmem [resolvable:$true] %s98_s1 }
  0x27   :  { %v115_v4 = vsel %vm62_vm0, 1.0, %v199_v3  ;;  %v116_v5 = vsel %vm63_vm1, 1.0, %v199_v3  ;;  %s169_s5 = scalar_lea.vmem %s99_s1, 512  ;;  %p174_p3 = scmp.lt.s32.totalorder %s99_s1, %s99_s1 }
  0x28   :  { %123 = vtanh.f32 %v64_v2  ;;  %77 = vst [vmem:[#allocation7] sm:$0xff] %v115_v4  ;;  %82 = vst [vmem:[#allocation7 + $0x8] sm:$0xff] %v116_v5  ;;  %p170_p2 = scmp.ne.s32.totalorder %s99_s1, %s169_s5  ;;  %p175_p4 = scmp.lt.s32.totalorder %s169_s5, %s169_s5 }
  0x2a   :  { %p176_p5 = por %p175_p4, %p174_p3 }
  0x2c   :  { %p177_p6 = pnand %p176_p5, %p170_p2 }
  0x32   :  { %v124_v6 = vpop.eup %123 }
  0x33   :  { %v66_v7 = vmul.f32 0.5, %v124_v6 }
  0x35   :  { %v67_v8 = vadd.f32 0.5, %v66_v7 }
  0x37   :  { %v72_v9 = vsel %vm62_vm0, %v67_v8, 0.0  ;;  %v73_v10 = vsel %vm63_vm1, %v67_v8, 0.0 }
  0x38   :  { %87 = vst [vmem:[#allocation7 + $0x10] sm:$0xff] %v72_v9  ;;  %92 = vst [vmem:[#allocation7 + $0x18] sm:$0xff] %v73_v10 }
  0x39   :  { %180 = shalt.err (!%p177_p6)
}
  0x3a   :  { %s181_s8 = scalar_lea.hbm %s256_s2, 512 }
  0x3b   :  { %p182_p7 = scmp.ne.s32.totalorder %s256_s2, %s181_s8  ;;  %p185_p8 = scmp.lt.u32.totalorder %s181_s8, %s256_s2 }
  0x3d   :  { %p187_p9 = pnand %p185_p8, %p182_p7 }
  0x3f   :  { %190 = shalt.err (!%p187_p9)
}
  0x40   :  { %s201_s13 = smov 128   ;;  %s202_s14 = smov 8  }
  0x41   :  { %104 = dma.vmem_to_hbm [thread:$0]  %s99_s1, 512, %s256_s2, [#allocation4], %s201_s13, %s201_s13, %s202_s14  }
  0x42   :  { %195 = dma.done.wait [#allocation4], 512  }
  0x43   :  { %196 = vsyncadd [#allocation4], 4294966784 }
  0x44   :  { %108 = vsyncpa [#allocation3], 1 }
  0x45   :  { %109 = vsyncpa [#allocation6], 1 }
  0x46   :  { %110 = vsyncpa [#allocation4], 1 }

</bundles_post_ra>
